<compile_context>
chip_gen: v6e
topology: v6e:2x2x1
jax: 0.10.0
libtpu: 0.0.40
codegen_flags: <defaults>
</compile_context>

<pallas_src>
import functools

import jax
import jax.numpy as jnp
from jax.experimental import pallas as pl
from jax.experimental.pallas import tpu as pltpu

EPS = 1e-5


# --------------------------------- kernels ------------------------------------
def _withbias_kernel(x_ref, w_ref, b_ref, o_ref):
    # x slab: (C, TH, W). Reduction is over the channel axis (axis 0); every
    # (h, w) position is independent, so masked tail rows of a partial block
    # cannot contaminate valid outputs.
    x = x_ref[...].astype(jnp.float32)                   # (C, TH, W)
    w = w_ref[...]                                        # (C, 1, 1), f32
    b = b_ref[...]                                        # (C, 1, 1), f32
    inv_c = jnp.float32(1.0 / x.shape[0])
    s1 = jnp.sum(x, axis=0, keepdims=True)                # (1, TH, W)
    s2 = jnp.sum(x * x, axis=0, keepdims=True)            # (1, TH, W)
    mu = s1 * inv_c
    var = s2 * inv_c - mu * mu                            # unbiased=False
    inv = jax.lax.rsqrt(var + jnp.float32(EPS))           # EUP op (free slot)
    o_ref[...] = ((x - mu) * inv * w + b).astype(o_ref.dtype)


def _biasfree_kernel(x_ref, w_ref, o_ref):
    x = x_ref[...].astype(jnp.float32)                    # (C, TH, W)
    w = w_ref[...]                                         # (C, 1, 1), f32
    inv_c = jnp.float32(1.0 / x.shape[0])
    s1 = jnp.sum(x, axis=0, keepdims=True)
    s2 = jnp.sum(x * x, axis=0, keepdims=True)
    mu = s1 * inv_c
    var = s2 * inv_c - mu * mu
    inv = jax.lax.rsqrt(var + jnp.float32(EPS))
    # BiasFree divides x (NOT x - mu) by sqrt(var + eps).
    o_ref[...] = (x * inv * w).astype(o_ref.dtype)


# ------------------------------ sizing helpers ---------------------------------
def _vmem_limit_bytes():
    """Generation-aware scoped-VMEM limit with headroom under the physical cap."""
    phys = 64 * 1024 * 1024           # conservative default = v7x per-core VMEM
    try:
        cap = getattr(pltpu.get_tpu_info(), "vmem_capacity_bytes", None)
        if cap:
            phys = int(cap)
    except Exception:
        pass
    # 75% of physical (48 MiB on v7x, 64+ MiB requestable on v5e/v6e),
    # capped at 64 MiB — plenty for a bandwidth-bound LayerNorm.
    return min(phys * 3 // 4, 64 * 1024 * 1024)


def _choose_h_tile(h, w, c, in_itemsize, out_itemsize, n_params, batch,
                   vmem_limit, min_steps=8):
    """Rows of H per block (multiple of 8, or full H).

    Sized so the full pipelined footprint fits comfortably in VMEM, then shrunk
    until the grid has enough steps to feed both v7x TensorCores and give the
    double-buffer pipeline something to overlap.
    """
    lanes = pl.cdiv(w, 128) * 128                         # padded lane width in VMEM
    row_in = c * lanes * in_itemsize                      # one H row, all channels
    row_out = c * lanes * out_itemsize
    row_f32 = c * lanes * 4
    # 2x input + 2x output (double buffers) + ~3 f32 in-kernel temporaries.
    row_total = 2 * row_in + 2 * row_out + 3 * row_f32
    # (C,1,1) f32 params pad to one (8,128) tile per channel; assume 2 buffers.
    param_bytes = n_params * 2 * c * 8 * 128 * 4
    budget = int(vmem_limit * 0.6) - param_bytes

    th_min = h if h < 8 else 8
    if budget < th_min * row_total:
        # Large-C guard: fall back to the minimal legal block if it still fits
        # under (most of) the explicit limit; otherwise fail loudly instead of
        # hitting a Mosaic VMEM OOM at compile time.
        if th_min * row_total + param_bytes <= int(vmem_limit * 0.9):
            return th_min
        raise ValueError(
            "LayerNorm block does not fit VMEM: minimal block "
            f"(C={c}, TH={th_min}, W={w}) needs ~{th_min * row_total + param_bytes} "
            f"bytes vs vmem_limit_bytes={vmem_limit}.")

    th = budget // row_total
    th = h if th >= h else max(8, (th // 8) * 8)

    def n_steps(t):
        return batch * pl.cdiv(h, t)

    # Ensure >= ~8 grid steps when the shape allows it (2 TCs on v7x + overlap).
    while n_steps(th) < min_steps and th > 8:
        new_th = max(8, pl.cdiv(th, 16) * 8)              # ~halve, keep mult-of-8
        if new_th >= th:
            break
        th = new_th
    return th


# --------------------------------- wrapper -------------------------------------
@functools.partial(jax.jit, static_argnames=("ln_type", "h_tile"))
def layer_norm_nchw(x, weight, bias=None, *, ln_type="WithBias", h_tile=None):
    """LayerNorm over the channel axis of an NCHW tensor (WFormer LayerNorm).

    Equivalent to to_4d(body(to_3d(x)), h, w): the einops rearranges are folded
    into the blocked NCHW access pattern (no transposes, no reshapes, no extra
    HBM traffic).
    """
    b, c, h, w = x.shape
    vmem_limit = _vmem_limit_bytes()
    n_params = 1 if ln_type == "BiasFree" else 2
    if h_tile is None:
        th = _choose_h_tile(h, w, c, x.dtype.itemsize, x.dtype.itemsize,
                            n_params, b, vmem_limit)
    else:
        th = h_tile
        assert th == h or (th % 8 == 0 and th <= h), \
            "h_tile must be a multiple of 8 or the full H"
    grid = (b, pl.cdiv(h, th))

    # Batch dim squeezed out of the kernel block. Last block dim is the full W,
    # so the (8,128) divisibility rule only constrains TH (multiple of 8 / full H).
    x_spec = pl.BlockSpec((None, c, th, w), lambda bi, hi: (bi, 0, hi, 0))
    o_spec = pl.BlockSpec((None, c, th, w), lambda bi, hi: (bi, 0, hi, 0))
    p_spec = pl.BlockSpec((c, 1, 1), lambda bi, hi: (0, 0, 0))  # resident params

    w3 = weight.astype(jnp.float32).reshape(c, 1, 1)

    compiler_params = pltpu.CompilerParams(
        dimension_semantics=("parallel", "parallel"),
        vmem_limit_bytes=vmem_limit,
    )
    out_shape = jax.ShapeDtypeStruct((b, c, h, w), x.dtype)

    if ln_type == "BiasFree":
        return pl.pallas_call(
            _biasfree_kernel,
            out_shape=out_shape,
            grid_spec=pltpu.PrefetchScalarGridSpec(
                num_scalar_prefetch=0,
                grid=grid,
                in_specs=[x_spec, p_spec],
                out_specs=o_spec,
            ),
            compiler_params=compiler_params,
        )(x, w3)

    b3 = bias.astype(jnp.float32).reshape(c, 1, 1)
    return pl.pallas_call(
        _withbias_kernel,
        out_shape=out_shape,
        grid_spec=pltpu.PrefetchScalarGridSpec(
            num_scalar_prefetch=0,
            grid=grid,
            in_specs=[x_spec, p_spec, p_spec],
            out_specs=o_spec,
        ),
        compiler_params=compiler_params,
    )(x, w3, b3)


# ---------------------------- reference (pure JAX) ------------------------------
def _ref_layer_norm_nchw(x, weight, bias, ln_type):
    xf = x.astype(jnp.float32)
    x3d = jnp.transpose(xf, (0, 2, 3, 1)).reshape(x.shape[0], -1, x.shape[1])
    mu = jnp.mean(x3d, axis=-1, keepdims=True)
    var = jnp.mean((x3d - mu) ** 2, axis=-1, keepdims=True)
    wf = weight.astype(jnp.float32)
    if ln_type == "BiasFree":
        y = x3d / jnp.sqrt(var + EPS) * wf
    else:
        y = (x3d - mu) / jnp.sqrt(var + EPS) * wf + bias.astype(jnp.float32)
    b, c, h, w = x.shape
    return jnp.transpose(y.reshape(b, h, w, c), (0, 3, 1, 2)).astype(x.dtype)


if __name__ == "__main__":
    key = jax.random.PRNGKey(0)
    kx, kw, kb, kx2, kw2, kb2, kx3 = jax.random.split(key, 7)

    # 1) Primary small test (module-consistent shapes): WithBias + BiasFree, f32.
    B, C, H, W = 2, 4, 16, 16
    x = jax.random.normal(kx, (B, C, H, W), dtype=jnp.float32)
    # Module __init__ uses ones / zeros; perturb deterministically so the
    # affine parameters are actually exercised.
    weight = jnp.ones((C,), jnp.float32) + 0.1 * jax.random.normal(kw, (C,), jnp.float32)
    bias = jnp.zeros((C,), jnp.float32) + 0.1 * jax.random.normal(kb, (C,), jnp.float32)

    y_wb = layer_norm_nchw(x, weight, bias, ln_type="WithBias")
    jax.block_until_ready(y_wb)
    ref_wb = _ref_layer_norm_nchw(x, weight, bias, "WithBias")
    assert jnp.allclose(y_wb, ref_wb, atol=1e-4, rtol=1e-4), "WithBias mismatch"

    y_bf = layer_norm_nchw(x, weight, None, ln_type="BiasFree")
    jax.block_until_ready(y_bf)
    ref_bf = _ref_layer_norm_nchw(x, weight, None, "BiasFree")
    assert jnp.allclose(y_bf, ref_bf, atol=1e-4, rtol=1e-4), "BiasFree mismatch"

    # 2) Non-divisible H with a forced small tile -> multi-step grid whose last
    #    block has masked (padded) rows, plus a W that is not a multiple of 128
    #    (legal because the last block dim is the full W).
    B2, C2, H2, W2 = 1, 8, 20, 24
    x2 = jax.random.normal(kx2, (B2, C2, H2, W2), dtype=jnp.float32)
    w2p = jnp.ones((C2,), jnp.float32) + 0.1 * jax.random.normal(kw2, (C2,), jnp.float32)
    b2p = jnp.zeros((C2,), jnp.float32) + 0.1 * jax.random.normal(kb2, (C2,), jnp.float32)
    y2 = layer_norm_nchw(x2, w2p, b2p, ln_type="WithBias", h_tile=8)
    jax.block_until_ready(y2)
    ref2 = _ref_layer_norm_nchw(x2, w2p, b2p, "WithBias")
    assert jnp.allclose(y2, ref2, atol=1e-4, rtol=1e-4), "masked-tail mismatch"

    # 3) bf16 activations (halves HBM bytes on v5e/v6e; f32 math in-kernel).
    x3 = jax.random.normal(kx3, (B, C, H, W), dtype=jnp.bfloat16)
    y3 = layer_norm_nchw(x3, weight, bias, ln_type="WithBias")
    jax.block_until_ready(y3)
    ref3 = _ref_layer_norm_nchw(x3, weight, bias, "WithBias")
    assert jnp.allclose(y3.astype(jnp.float32), ref3.astype(jnp.float32),
                        atol=5e-2, rtol=5e-2), "bf16 mismatch"

    print("KERNEL_OK")
</pallas_src>

<mosaic_0001>
module attributes {stable_mosaic.version = 11 : i64} {
  func.func @_withbias_kernel(%arg0: i32, %arg1: i32, %arg2: memref<1x4x8x16xf32, #tpu.memory_space<vmem>>, %arg3: memref<4x1x1xf32, #tpu.memory_space<vmem>>, %arg4: memref<4x1x1xf32, #tpu.memory_space<vmem>>, %arg5: memref<1x4x8x16xf32, #tpu.memory_space<vmem>>) attributes {dimension_semantics = [#tpu.dimension_semantics<parallel>, #tpu.dimension_semantics<parallel>], iteration_bounds = array<i64: 2, 2>, scalar_prefetch = 0 : i64, scratch_operands = 0 : i64, tpu.core_type = #tpu.core_type<tc>, window_params = [{transform_indices = @transform_0, window_bounds = array<i64: 1, 4, 8, 16>}, {pipeline_mode = #tpu.pipeline_mode<synchronous>, transform_indices = @transform_1, window_bounds = array<i64: 4, 1, 1>}, {pipeline_mode = #tpu.pipeline_mode<synchronous>, transform_indices = @transform_2, window_bounds = array<i64: 4, 1, 1>}, {transform_indices = @transform_3, window_bounds = array<i64: 1, 4, 8, 16>}]} {
    %c0 = arith.constant 0 : index
    %c0_0 = arith.constant 0 : index
    %c0_1 = arith.constant 0 : index
    %c0_2 = arith.constant 0 : index
    %0 = vector.load %arg2[%c0, %c0_0, %c0_1, %c0_2] : memref<1x4x8x16xf32, #tpu.memory_space<vmem>>, vector<1x4x8x16xf32>
    %1 = vector.shape_cast %0 : vector<1x4x8x16xf32> to vector<4x8x16xf32>
    %c0_3 = arith.constant 0 : index
    %c0_4 = arith.constant 0 : index
    %c0_5 = arith.constant 0 : index
    %2 = vector.load %arg3[%c0_3, %c0_4, %c0_5] : memref<4x1x1xf32, #tpu.memory_space<vmem>>, vector<4x1x1xf32>
    %c0_6 = arith.constant 0 : index
    %c0_7 = arith.constant 0 : index
    %c0_8 = arith.constant 0 : index
    %3 = vector.load %arg4[%c0_6, %c0_7, %c0_8] : memref<4x1x1xf32, #tpu.memory_space<vmem>>, vector<4x1x1xf32>
    %cst = arith.constant dense<0.000000e+00> : vector<8x16xf32>
    %4 = vector.multi_reduction <add>, %1, %cst [0] : vector<4x8x16xf32> to vector<8x16xf32>
    %5 = vector.shape_cast %4 : vector<8x16xf32> to vector<1x8x16xf32>
    %6 = arith.mulf %1, %1 : vector<4x8x16xf32>
    %cst_9 = arith.constant dense<0.000000e+00> : vector<8x16xf32>
    %7 = vector.multi_reduction <add>, %6, %cst_9 [0] : vector<4x8x16xf32> to vector<8x16xf32>
    %8 = vector.shape_cast %7 : vector<8x16xf32> to vector<1x8x16xf32>
    %cst_10 = arith.constant 2.500000e-01 : f32
    %9 = vector.broadcast %cst_10 : f32 to vector<1x8x16xf32>
    %10 = arith.mulf %5, %9 : vector<1x8x16xf32>
    %cst_11 = arith.constant 2.500000e-01 : f32
    %11 = vector.broadcast %cst_11 : f32 to vector<1x8x16xf32>
    %12 = arith.mulf %8, %11 : vector<1x8x16xf32>
    %13 = arith.mulf %10, %10 : vector<1x8x16xf32>
    %14 = arith.subf %12, %13 : vector<1x8x16xf32>
    %cst_12 = arith.constant 9.99999974E-6 : f32
    %15 = vector.broadcast %cst_12 : f32 to vector<1x8x16xf32>
    %16 = arith.addf %14, %15 : vector<1x8x16xf32>
    %17 = math.rsqrt %16 : vector<1x8x16xf32>
    %18 = vector.broadcast %10 : vector<1x8x16xf32> to vector<4x8x16xf32>
    %19 = arith.subf %1, %18 : vector<4x8x16xf32>
    %20 = vector.broadcast %17 : vector<1x8x16xf32> to vector<4x8x16xf32>
    %21 = arith.mulf %19, %20 : vector<4x8x16xf32>
    %22 = vector.broadcast %2 : vector<4x1x1xf32> to vector<4x8x16xf32>
    %23 = arith.mulf %21, %22 : vector<4x8x16xf32>
    %24 = vector.broadcast %3 : vector<4x1x1xf32> to vector<4x8x16xf32>
    %25 = arith.addf %23, %24 : vector<4x8x16xf32>
    %c0_13 = arith.constant 0 : index
    %c0_14 = arith.constant 0 : index
    %c0_15 = arith.constant 0 : index
    %c0_16 = arith.constant 0 : index
    %26 = vector.load %arg5[%c0_13, %c0_14, %c0_15, %c0_16] : memref<1x4x8x16xf32, #tpu.memory_space<vmem>>, vector<1x4x8x16xf32>
    %27 = vector.shape_cast %26 : vector<1x4x8x16xf32> to vector<4x8x16xf32>
    %28 = vector.shape_cast %25 : vector<4x8x16xf32> to vector<1x4x8x16xf32>
    tpu.vector_store %arg5[%c0_13, %c0_14, %c0_15, %c0_16], %28 {strides = array<i32>} : memref<1x4x8x16xf32, #tpu.memory_space<vmem>>, vector<1x4x8x16xf32>,
    return
  }
  func.func @transform_0(%arg0: i32, %arg1: i32) -> (i32, i32, i32, i32) {
    %c0_i32 = arith.constant 0 : i32
    %c0_i32_0 = arith.constant 0 : i32
    %c0_i32_1 = arith.constant 0 : i32
    return %arg0, %c0_i32, %arg1, %c0_i32_0 : i32, i32, i32, i32
  }
  func.func @transform_1(%arg0: i32, %arg1: i32) -> (i32, i32, i32) {
    %c0_i32 = arith.constant 0 : i32
    %c0_i32_0 = arith.constant 0 : i32
    %c0_i32_1 = arith.constant 0 : i32
    %c0_i32_2 = arith.constant 0 : i32
    return %c0_i32, %c0_i32_0, %c0_i32_1 : i32, i32, i32
  }
  func.func @transform_2(%arg0: i32, %arg1: i32) -> (i32, i32, i32) {
    %c0_i32 = arith.constant 0 : i32
    %c0_i32_0 = arith.constant 0 : i32
    %c0_i32_1 = arith.constant 0 : i32
    %c0_i32_2 = arith.constant 0 : i32
    return %c0_i32, %c0_i32_0, %c0_i32_1 : i32, i32, i32
  }
  func.func @transform_3(%arg0: i32, %arg1: i32) -> (i32, i32, i32, i32) {
    %c0_i32 = arith.constant 0 : i32
    %c0_i32_0 = arith.constant 0 : i32
    %c0_i32_1 = arith.constant 0 : i32
    return %arg0, %c0_i32, %arg1, %c0_i32_0 : i32, i32, i32, i32
  }
}

</mosaic_0001>

<bundles_post_ra>
// kernel: layer_norm_nchw.1
= control target key start
LH: loop header
LB: loop body
LE: loop exit
PB: predicated region body
PF: predicated region fallthrough
CT: control target
= control target key end

     0   :  { %8 = vsyncpa [#allocation3], 0  ;;  %s917_s0 = inlined_call_operand.hbm [shape: f32[2,4,16,16], index: 0, kind: input, shape index: {}]   ;;  %s918_s1 = inlined_call_operand.vmem [shape: f32[4,1,1], index: 1, kind: input, shape index: {}]   ;;  %s919_s2 = inlined_call_operand.vmem [shape: f32[4,1,1], index: 2, kind: input, shape index: {}]   ;;  %s920_s3 = inlined_call_operand.hbm [shape: f32[2,4,16,16], index: 3, kind: output, shape index: {}]  }
   0x1   :  { %10 = vsyncpa [#allocation3 + $0x1], 0 }
   0x2   :  { %11 = vsyncpa [#allocation4], 0 }
   0x3   :  { %13 = vsyncpa [#allocation4 + $0x1], 0  ;;  %s705_s12 = smov 0   ;;  %s707_s13 = smov 0  }
   0x4   :  { %s709_s14 = smov 0   ;;  %s711_s15 = smov 0  }
   0x5   :  { %s713_s16 = smov 0   ;;  %s715_s17 = smov 0  }
   0x6   :  { %s717_s18 = smov 0   ;;  %s719_s19 = smov 0  }
   0x7 LB: > { %s438_s20 = sadd.s32 4294967295, %s674_s19   ;;  %s439_s21 = sadd.s32 4294967294, %s674_s19   ;;  %s674_s19 = sphi %s719_s19, %s19_s19   ;;  %s670_s18 = sphi %s717_s18, %s938_s18   ;;  %s666_s17 = sphi %s715_s17, %s937_s17   ;;  %s662_s16 = sphi %s713_s16, %s936_s16   ;;  %s658_s15 = sphi %s711_s15, %s935_s15   ;;  %s654_s14 = sphi %s709_s14, %s934_s14   ;;  %s650_s13 = sphi %s707_s13, %s933_s13   ;;  %s646_s12 = sphi %s705_s12, %s932_s12  }
   0x8   : > { %s28_s22 = sadd.s32 1, %s666_s17  ;;  %s31_s23 = sadd.s32 1, %s670_s18 }
   0x9   : > { %p29_p0 = scmp.ge.s32.totalorder %s28_s22, 2  ;;  %s40_s24 = sadd.s32 1, %s654_s14 }
   0xa   : > { %p47_p1 = scmp.ne.s32.totalorder %s654_s14, %s650_s13  ;;  %p48_p2 = scmp.eq.s32.totalorder %s674_s19, 0 }
   0xb   : > { %s940_s22 = smov (%p29_p0, %s28_s22), 0  ;;  %s942_s23 = smov (!%p29_p0, %s31_s23), %s670_s18 }
   0xc   : > { %923 = sst [smem:[#allocation8_spill]] %s940_s22  ;;  %s36_s25 = ssub.s32 %s666_s17, %s940_s22 }
   0xd   : > { %p758_p3 = por %p48_p2, %p47_p1  ;;  %p33_p4 = scmp.ge.s32.totalorder %s942_s23, 2 }
   0xe   : > { %p53_p5 = scmp.ne.s32.totalorder %s650_s13, %s646_s12  ;;  %p54_p6 = scmp.eq.s32.totalorder %s438_s20, 0 }
   0xf   : > { %p121_p7 = scmp.eq.s32.totalorder %s438_s20, 3  ;;  %s944_s23 = smov (%p33_p4, %s942_s23), 0 }
  0x10   : > { %925 = sst [smem:[#allocation9_spill]] %s944_s23  ;;  %p766_p8 = por %p54_p6, %p53_p5 }
  0x11   : > { %p770_p9 = por %p121_p7, %p47_p1  ;;  %s35_s29 = ssub.s32 %s670_s18, %s944_s23 }
  0x12   : > { %p127_p10 = scmp.eq.s32.totalorder %s439_s21, 3  ;;  %s37_s30 = sor.u32 %s36_s25, %s35_s29 }
  0x13   : > { %p38_p11 = scmp.eq.s32.totalorder %s37_s30, 0  ;;  %p473_p13 = scmp.lt.s32.totalorder %s674_s19, 4 }
  0x14   : > { %p776_p12 = por %p127_p10, %p53_p5  ;;  %s153_s5 = sand.u32 1, %s654_s14  }
  0x15   : > { %s783_s6 = scalar_select %p38_p11, %s654_s14, %s40_s24  }
  0x16   : > { %s442_s7 = sshll.u32 %s153_s5, 5  ;;  %s443_s8 = sshll.u32 %s670_s18, 3 }
  0x17   : > { %s162_s9 = sadd.s32 %s666_s17, %s443_s8  ;;  %s157_s10 = scalar_lea.vmem [#allocation2], %s442_s7 }
  0x18   : > { %s165_s11 = sshll.u32 %s157_s10, 4  ;;  %s444_s20 = sshll.u32 %s162_s9, 7  ;;  %s166_s11 = int_to_ptr.vmem [resolvable:$true] %s165_s11 }
  0x19   : > { %s164_s21 = scalar_lea.hbm %s917_s0, %s444_s20  ;;  %p792_p0 = pnand %p473_p13, %p758_p3 }
  0x1a   : > { %s154_s29 = scalar_lea.sflag [#allocation3], %s153_s5  ;;  %s563_s24 = scalar_lea.vmem %s166_s11, 512 }
  0x1b   : > { %p552_p1 = pneg %p792_p0  ;;  %p564_p2 = scmp.ne.s32.totalorder %s166_s11, %s563_s24 }
  0x1c   : > { %s676_s30 = smov [#allocation2]  }
  0x1d   : > { %p566_p4 = pnand %p564_p2, %p552_p1  ;;  %s568_s7 = sshll.u32 %s676_s30, 4  ;;  %s569_s7 = int_to_ptr.vmem [resolvable:$false] %s568_s7 }
  0x1e   : > { %s570_s8 = scalar_lea.vmem %s569_s7, 1024  ;;  %p571_p6 = scmp.lt.s32.totalorder %s166_s11, %s569_s7 }
  0x1f   : > { %p567_p5 = pneg %p566_p4  ;;  %p572_p7 = scmp.lt.s32.totalorder %s570_s8, %s563_s24 }
  0x21   : > { %p573_p10 = por %p572_p7, %p571_p6 }
  0x23   : > { %p574_p11 = pnand %p573_p10, %p567_p5 }
  0x25   : > { %577 = shalt.err (!%p574_p11)
}
  0x26   : > { %s677_s22 = smov 256   ;;  %s678_s23 = smov 128  }
  0x27   : > { %s679_s26 = smov 8   ;;  %p445_p3 = scmp.ge.s32.totalorder %s674_s19, 1 }
  0x28   : > { %468 = dma.hbm_to_vmem [thread:$0]  (!%p792_p0), %s164_s21, 512, %s166_s11, %s154_s29, %s677_s22, %s678_s23, %s679_s26  }
  0x29   : > { %p173_p13 = scmp.lt.s32.totalorder %s674_s19, 5 }
  0x2b   : > { %p174_p1 = pnand %p445_p3, %p173_p13 }
  0x2c   : > { %s803_s5 = sand.u32 (!%p174_p1), 1, %s650_s13  }
  0x2d   : > { %177 = sbr.rel (%p174_p1) target bundleno = 206 (0xce), region = 32  ;;  %s446_s9 = sshll.u32 (!%p174_p1), %s803_s5, 5 }
  0x2e   : > { %s180_s10 = scalar_lea.sflag (!%p174_p1), [#allocation3], %s803_s5  ;;  %s809_s20 = scalar_lea.vmem (!%p174_p1), [#allocation2], %s446_s9 }
  0x32   : > { %637 = dma.done.wait (%p766_p8), %s180_s10, 512  }
  0x33   : > { %639 = vsyncadd (%p766_p8), %s180_s10, 4294966784  ;;  %v680_v0 = vmov 0   ;;  %v450_v1 = vld [vmem:[%s918_s1 + $0x2] ss:$0 sm:$0xff]  ;;  %v448_v2 = vld [vmem:[%s918_s1] ss:$0 sm:$0xff] }
  0x34   : > { %547 = vset.pattern.permute.xlu1 %v680_v0  ;;  %546 = vset.pattern.permute.xlu0 %v680_v0  ;;  %v451_v3 = vld [vmem:[%s918_s1 + $0x3] ss:$0 sm:$0xff]  ;;  %v449_v4 = vld [vmem:[%s918_s1 + $0x1] ss:$0 sm:$0xff]  ;;  %v452_v6 = vld [vmem:[%s919_s2] ss:$0 sm:$0xff] }
  0x35   : > { %280 = vperm.xlu1 %547, %v450_v1   ;;  %272 = vperm.xlu0 %546, %v448_v2   ;;  %v453_v5 = vld [vmem:[%s919_s2 + $0x1] ss:$0 sm:$0xff]  ;;  %v455_v7 = vld [vmem:[%s919_s2 + $0x3] ss:$0 sm:$0xff]  ;;  %v454_v8 = vld [vmem:[%s919_s2 + $0x2] ss:$0 sm:$0xff] }
  0x36   : > { %vm218_vm0 = vcmask 130048   ;;  %v206_v9 = vld [vmem:[%s809_s20] sm:$0xff]  ;;  %v207_v10 = vld [vmem:[%s809_s20 + $0x8] sm:$0xff]  ;;  %v208_v15 = vld [vmem:[%s809_s20 + $0x10] sm:$0xff]  ;;  %s205_s24 = scalar_lea.vmem [#allocation5], %s446_s9  ;;  %s336_s7 = scalar_lea.sflag [#allocation4], %s803_s5 }
  0x37   : > { %v219_v11 = vsel %vm218_vm0, %v206_v9, 0.0  ;;  %v220_v12 = vsel %vm218_vm0, %v207_v10, 0.0  ;;  %v226_v13 = vmul.f32 %v206_v9, %v206_v9  ;;  %v227_v14 = vmul.f32 %v207_v10, %v207_v10  ;;  %v209_v21 = vld [vmem:[%s809_s20 + $0x18] sm:$0xff]  ;;  %s457_s20 = sshll.u32 %s662_s16, 3  ;;  %s350_s30 = sshll.u32 %s205_s24, 4  ;;  %s855_s30 = int_to_ptr.vmem [resolvable:$true] %s350_s30 }
  0x38   : > { %v221_v16 = vadd.f32 %v220_v12, %v219_v11  ;;  %v222_v17 = vsel %vm218_vm0, %v208_v15, 0.0  ;;  %v228_v18 = vmul.f32 %v208_v15, %v208_v15  ;;  %v224_v24 = vsel %vm218_vm0, %v209_v21, 0.0  ;;  %s347_s29 = sadd.s32 %s658_s15, %s457_s20  ;;  %s578_s8 = scalar_lea.vmem %s855_s30, 512 }
  0x39   : > { %284 = vperm.xlu1 %547, %v451_v3   ;;  %276 = vperm.xlu0 %546, %v449_v4   ;;  %v230_v19 = vsel %vm218_vm0, %v226_v13, 0.0  ;;  %v231_v20 = vsel %vm218_vm0, %v227_v14, 0.0  ;;  %v229_v25 = vmul.f32 %v209_v21, %v209_v21  ;;  %s458_s27 = sshll.u32 %s347_s29, 7  ;;  %p579_p8 = scmp.ne.s32.totalorder %s855_s30, %s578_s8 }
  0x3a   : > { %v223_v22 = vadd.f32 %v222_v17, %v221_v16  ;;  %v232_v23 = vadd.f32 %v231_v20, %v230_v19  ;;  %v233_v26 = vsel %vm218_vm0, %v228_v18, 0.0  ;;  %s862_s9 = scalar_lea.hbm %s920_s3, %s458_s27  ;;  %s681_s22 = smov [#allocation5]  }
  0x3b   : > { %v235_v29 = vsel %vm218_vm0, %v229_v25, 0.0  ;;  %p580_p0 = pnand %p579_p8, %p770_p9  ;;  %s582_s23 = sshll.u32 %s681_s22, 4  ;;  %s583_s23 = int_to_ptr.vmem [resolvable:$false] %s582_s23 }
  0x3c   : > { %v225_v27 = vadd.f32 %v224_v24, %v223_v22  ;;  %v234_v28 = vadd.f32 %v233_v26, %v232_v23  ;;  %s584_s26 = scalar_lea.vmem %s583_s23, 1024  ;;  %p585_p4 = scmp.lt.s32.totalorder %s855_s30, %s583_s23 }
  0x3d   : > { %316 = vperm.xlu1 %547, %v453_v5   ;;  %312 = vperm.xlu0 %546, %v452_v6   ;;  %p581_p2 = pneg %p580_p0  ;;  %p586_p5 = scmp.lt.s32.totalorder %s584_s26, %s578_s8 }
  0x3e   : > { %v236_v30 = vadd.f32 %v235_v29, %v234_v28  ;;  %v237_v31 = vmul.f32 0.25, %v225_v27 }
  0x3f   : > { %p587_p6 = por %p586_p5, %p585_p4 }
  0x40   : > { %v238_v32 = vmul.f32 0.25, %v236_v30  ;;  %v239_v33 = vmul.f32 %v237_v31, %v237_v31  ;;  %v243_v36 = vsub.f32 %v206_v9, %v237_v31  ;;  %v244_v37 = vsub.f32 %v207_v10, %v237_v31 }
  0x41   : > { %324 = vperm.xlu1 %547, %v455_v7   ;;  %320 = vperm.xlu0 %546, %v454_v8   ;;  %v245_v41 = vsub.f32 %v208_v15, %v237_v31  ;;  %v246_v43 = vsub.f32 %v209_v21, %v237_v31  ;;  %p588_p7 = pnand %p587_p6, %p581_p2 }
  0x42   : > { %v240_v34 = vsub.f32 %v238_v32, %v239_v33 }
  0x44   : > { %v241_v35 = vadd.f32 1e-05, %v240_v34 }
  0x46   : > { %548 = vrsqrt.f32 %v241_v35 }
  0x53   : > { %v549_v38 = vpop.eup %548 }
  0x54   : > { %v247_v42 = vmul.f32 %v549_v38, %v243_v36  ;;  %v248_v44 = vmul.f32 %v549_v38, %v244_v37  ;;  %v249_v47 = vmul.f32 %v549_v38, %v245_v41  ;;  %v250_v49 = vmul.f32 %v549_v38, %v246_v43 }
  0xb0   : > { %v281_v39 = vpop.permute.xlu1 %280  ;;  %v273_v40 = vpop.permute.xlu0 %272 }
  0xb1   : > { %v287_v48 = vmul.f32 %v273_v40, %v247_v42  ;;  %v289_v55 = vmul.f32 %v281_v39, %v249_v47 }
  0xb4   : > { %v285_v45 = vpop.permute.xlu1 %284  ;;  %v277_v46 = vpop.permute.xlu0 %276 }
  0xb5   : > { %v288_v50 = vmul.f32 %v277_v46, %v248_v44  ;;  %v290_v56 = vmul.f32 %v285_v45, %v250_v49 }
  0xb8   : > { %v317_v51 = vpop.permute.xlu1 %316  ;;  %v313_v52 = vpop.permute.xlu0 %312 }
  0xb9   : > { %v328_v53 = vadd.f32 %v317_v51, %v288_v50  ;;  %v327_v54 = vadd.f32 %v313_v52, %v287_v48 }
  0xbb   : > { %332 = vst.msk [vmem:[%s205_s24 + $0x8] sm:$0xff] %vm218_vm0, %v328_v53  ;;  %331 = vst.msk [vmem:[%s205_s24] sm:$0xff] %vm218_vm0, %v327_v54 }
  0xbc   : > { %v325_v57 = vpop.permute.xlu1 %324  ;;  %v321_v58 = vpop.permute.xlu0 %320 }
  0xbd   : > { %v330_v59 = vadd.f32 %v325_v57, %v290_v56  ;;  %v329_v60 = vadd.f32 %v321_v58, %v289_v55 }
  0xbf   : > { %334 = vst.msk [vmem:[%s205_s24 + $0x18] sm:$0xff] %vm218_vm0, %v330_v59  ;;  %333 = vst.msk [vmem:[%s205_s24 + $0x10] sm:$0xff] %vm218_vm0, %v329_v60 }
  0xc0   : > { %591 = shalt.err (!%p588_p7)
}
  0xc1   : > { %s592_s10 = scalar_lea.hbm %s862_s9, 512  ;;  %s596_s25 = scalar_lea.hbm %s920_s3, 2048 }
  0xc2   : > { %p593_p10 = scmp.ne.s32.totalorder %s862_s9, %s592_s10  ;;  %p597_p13 = scmp.lt.s32.totalorder %s862_s9, %s920_s3 }
  0xc3   : > { %p598_p1 = scmp.lt.s32.totalorder %s596_s25, %s592_s10 }
  0xc4   : > { %p594_p11 = pnand %p593_p10, %p770_p9 }
  0xc5   : > { %p599_p8 = por %p598_p1, %p597_p13 }
  0xc6   : > { %p595_p3 = pneg %p594_p11 }
  0xc8   : > { %p600_p0 = pnand %p599_p8, %p595_p3 }
  0xca   : > { %603 = shalt.err (!%p600_p0)
}
  0xcb   : > { %s682_s24 = smov 128   ;;  %s683_s27 = smov 256  }
  0xcc   : > { %s684_s15 = smov 8  }
  0xcd   : > { %463 = dma.vmem_to_hbm [thread:$0]  (%p770_p9), %s855_s30, 512, %s862_s9, %s336_s7, %s682_s24, %s683_s27, %s684_s15  }
  0xce PF: > { %p474_p2 = scmp.ge.s32.totalorder %s674_s19, 2  ;;  %s365_s16 = sand.u32 1, %s646_s12  }
  0xcf   : > { %s366_s8 = scalar_lea.sflag [#allocation4], %s365_s16 }
  0xd0   : > { %p470_p4 = pnand %p474_p2, %p776_p12 }
  0xd2   : > { %p471_p5 = pneg %p470_p4 }
  0xd4   : > { %641 = dma.done.wait (%p471_p5), %s366_s8, 512  }
  0xd5   : > { %643 = vsyncadd (%p471_p5), %s366_s8, 4294966784  ;;  %s19_s19 = sadd.s32 1, %s674_s19   ;;  %s930_s28 = sld [smem:[#allocation8_spill]] }
  0xd6   : > { %p16_p6 = scmp.ge.s32.totalorder %s19_s19, 6   ;;  %s931_s5 = sld [smem:[#allocation9_spill]] }
  0xd7   : > { %s932_s12 = smov %s650_s13  ;;  %s933_s13 = smov %s654_s14 }
  0xd8   : > { %s934_s14 = smov %s783_s6  ;;  %s935_s15 = smov %s666_s17 }
  0xd9   : > { %s936_s16 = smov %s670_s18  ;;  %18 = sbr.rel (!%p16_p6) target bundleno = 7 (0x7), region = 77 }
  0xdb   : > { %s937_s17 = smov %s930_s28 }
  0xdc   : > { %s938_s18 = smov %s931_s5 }
  0xde   :  { %371 = vsyncpa [#allocation3], 1 }
  0xdf   :  { %373 = vsyncpa [#allocation3 + $0x1], 1 }
  0xe0   :  { %374 = vsyncpa [#allocation4], 1 }
  0xe1   :  { %376 = vsyncpa [#allocation4 + $0x1], 1 }

</bundles_post_ra>
